<compile_context>
chip_gen: v7x
topology: tpu7x:2x2x1
jax: 0.10.0
libtpu: 0.0.40
codegen_flags: <defaults>
</compile_context>

<pallas_src>
import functools

import jax
import jax.numpy as jnp
from jax.experimental import pallas as pl
from jax.experimental.pallas import tpu as pltpu

_LANES = 128
_SUBLANES = 8
_CHUNK_ROWS = 512                       # 512x128 f32 = 256 KiB in-kernel chunk
_TARGET_BLOCK_BYTES = 4 * 1024 * 1024   # ~4 MiB HBM<->VMEM blocks per grid step
_MIN_SPLIT_STEPS = 4                    # >=4 pipelined steps per TensorCore split
_VMEM_LIMIT_BYTES = 32 * 1024 * 1024
_MAX_CHANNEL_SLAB_BYTES = 8 * 1024 * 1024

_MODE_TO_STAT = {
    "norm": "sumsq", "l2": "sumsq", "abs_l2": "sumsq", "mse": "sumsq",
    "mean": "sum", "abs_mean": "abs", "bce": "softplus",
}


@functools.lru_cache(maxsize=None)
def _num_tensorcores():
    """TensorCores per JAX device: 2 on megacore chips (v4/v5p/v7x), else 1."""
    try:
        kind = jax.devices()[0].device_kind.lower()
    except Exception:  # defensive: perf hint only, never a correctness issue
        return 1
    if "lite" in kind or "v5e" in kind or "v6e" in kind:
        return 1                         # v5e / v6e: single TensorCore per chip
    if any(tag in kind for tag in ("v7", "7x", "v4", "v5")):
        return 2                         # v7x / v4 / v5p megacore
    return 1


def _stat_value(stat, x):
    """Per-element statistic in float32 (works on values in- and out-of-kernel)."""
    if stat == "sumsq":
        return x * x
    if stat == "sum":
        return x
    if stat == "abs":
        return jnp.abs(x)
    if stat == "softplus":
        # BCEWithLogitsLoss(input, zeros) = mean(softplus(x)); only used for 'bce'.
        return jnp.logaddexp(jnp.float32(0.0), x)
    raise ValueError(stat)


# --------------------------------------------------------------------------
# Flat streaming kernel: (G, rows, 128) -> (G, nsplit, 8, 128) partial sums.
# --------------------------------------------------------------------------
def _plan_blocks(rows, itemsize, ncores):
    """Pick (block_rows, chunk_rows, nsplit, steps); None => too small for a kernel."""
    if rows < _SUBLANES:
        return None
    target_rows = max(
        _CHUNK_ROWS,
        (_TARGET_BLOCK_BYTES // (_LANES * itemsize)) // _CHUNK_ROWS * _CHUNK_ROWS)
    if rows < _CHUNK_ROWS:
        chunk_rows = (rows // _SUBLANES) * _SUBLANES
        block_rows = chunk_rows
    else:
        chunk_rows = _CHUNK_ROWS
        block_rows = min(target_rows, (rows // _CHUNK_ROWS) * _CHUNK_ROWS)
        if ncores >= 2:
            # Shrink blocks so a 2-way split still leaves each core >=4 steps.
            want = (rows // (2 * _MIN_SPLIT_STEPS)) // _CHUNK_ROWS * _CHUNK_ROWS
            if want >= _CHUNK_ROWS:
                block_rows = min(block_rows, want)
    total_blocks = -(-rows // block_rows)
    nsplit = 2 if (ncores >= 2 and total_blocks >= 2 * _MIN_SPLIT_STEPS) else 1
    steps = -(-total_blocks // nsplit)
    return block_rows, chunk_rows, nsplit, steps


def _make_stream_kernel(stat, rows_valid, block_rows, chunk_rows, steps, may_mask):
    """acc(8,128) += folded stat over a (block_rows,128) tile, chunked, gated mask."""
    assert block_rows % chunk_rows == 0 and chunk_rows % _SUBLANES == 0
    n_chunks = block_rows // chunk_rows

    def _fold(v):
        # (chunk_rows, 128) -> (8, 128): splits the sublane axis on an 8-boundary,
        # so this lowers to pure vreg adds (no relayout).
        return v.reshape(chunk_rows // _SUBLANES, _SUBLANES, _LANES).sum(axis=0)

    def _chunk_stat(x_ref, j):
        r0 = pl.multiple_of(j * chunk_rows, _SUBLANES)
        x = x_ref[pl.ds(r0, chunk_rows), :].astype(jnp.float32)
        return _stat_value(stat, x)

    def kernel(x_ref, acc_ref):
        i = pl.program_id(2)             # reduction ("arbitrary") axis

        @pl.when(i == 0)
        def _init():
            acc_ref[...] = jnp.zeros_like(acc_ref)

        zero = jnp.zeros((_SUBLANES, _LANES), jnp.float32)

        def clean_body(j, part):
            return part + _fold(_chunk_stat(x_ref, j))

        if not may_mask:
            acc_ref[...] += jax.lax.fori_loop(0, n_chunks, clean_body, zero)
        else:
            c = pl.program_id(1)
            # Rows of this group still valid at the start of this tile (row
            # counts fit int32 comfortably; no element-index overflow).
            rows_left = rows_valid - (c * steps + i) * block_rows

            @pl.when(rows_left >= block_rows)
            def _clean():                 # fast path: identical to unmasked codegen
                acc_ref[...] += jax.lax.fori_loop(0, n_chunks, clean_body, zero)

            @pl.when(rows_left < block_rows)
            def _ragged():                # only the last / clamped tile pays this
                def masked_body(j, part):
                    v = _chunk_stat(x_ref, j)
                    row = (jax.lax.broadcasted_iota(
                        jnp.int32, (chunk_rows, _LANES), 0) + j * chunk_rows)
                    v = jnp.where(row < rows_left, v, jnp.float32(0.0))
                    return part + _fold(v)
                acc_ref[...] += jax.lax.fori_loop(0, n_chunks, masked_body, zero)

    return kernel


@functools.partial(jax.jit, static_argnames=("stat",))
def _flat_group_stat(x2d, stat):
    """(G,) float32 totals of `stat` over the M elements of each of G groups."""
    g_count, m = x2d.shape
    rows = m // _LANES
    lane_tail = m - rows * _LANES
    plan = _plan_blocks(rows, x2d.dtype.itemsize, _num_tensorcores())

    if plan is None:
        # Tiny group (< 1 KiB): a kernel launch is pure overhead.
        return jnp.sum(_stat_value(stat, x2d.astype(jnp.float32)), axis=1)

    block_rows, chunk_rows, nsplit, steps = plan
    total_blocks = -(-rows // block_rows)
    coverage = nsplit * steps * block_rows
    may_mask = coverage != rows
    # no-mask must imply every tile is a full, in-bounds block.
    assert may_mask or (rows % block_rows == 0 and nsplit * steps == total_blocks)

    totals = jnp.zeros((g_count,), jnp.float32)
    if lane_tail:
        # Kernel on the 128-aligned prefix; tiny (<128 elem/group) tail in JAX.
        body = x2d[:, : rows * _LANES]
        tail = x2d[:, rows * _LANES:]
        totals = totals + jnp.sum(_stat_value(stat, tail.astype(jnp.float32)), axis=1)
    else:
        body = x2d                       # pure reshape below, no copy
    x3 = body.reshape(g_count, rows, _LANES)

    in_spec = pl.BlockSpec(
        (None, block_rows, _LANES),
        # Clamp so split over-coverage re-reads the last block; those tiles are
        # fully masked inside the kernel (rows_left <= 0).
        lambda g, c, i: (g, jnp.minimum(c * steps + i, total_blocks - 1), 0))
    out_spec = pl.BlockSpec(
        (None, None, _SUBLANES, _LANES), lambda g, c, i: (g, c, 0, 0))

    n_elems = g_count * rows * _LANES
    cost = pl.CostEstimate(
        flops=2 * n_elems,
        transcendentals=(2 * n_elems) if stat == "softplus" else 0,
        bytes_accessed=n_elems * x2d.dtype.itemsize
        + g_count * nsplit * _SUBLANES * _LANES * 4)

    partials = pl.pallas_call(
        _make_stream_kernel(stat, rows, block_rows, chunk_rows, steps, may_mask),
        out_shape=jax.ShapeDtypeStruct(
            (g_count, nsplit, _SUBLANES, _LANES), jnp.float32),
        grid_spec=pltpu.PrefetchScalarGridSpec(
            num_scalar_prefetch=0,
            grid=(g_count, nsplit, steps),
            in_specs=[in_spec],
            out_specs=out_spec),
        compiler_params=pltpu.CompilerParams(
            dimension_semantics=("parallel", "parallel", "arbitrary"),
            vmem_limit_bytes=_VMEM_LIMIT_BYTES),
        cost_estimate=cost,
    )(x3)

    # Final reduce of the tiny (G, nsplit, 8, 128) partial slab in plain JAX.
    return totals + jnp.sum(partials, axis=(1, 2, 3))


# --------------------------------------------------------------------------
# Channel-slice kernel: per-channel totals straight out of the NCHW tensor,
# channel ids scalar-prefetched into SMEM (no gather / transpose copies).
# --------------------------------------------------------------------------
def _make_channel_kernel(stat, h, w):
    aligned = (h % _SUBLANES == 0) and (w % _LANES == 0)

    def kernel(cids_ref, x_ref, acc_ref):
        del cids_ref                      # only used by the index_maps
        b = pl.program_id(1)

        @pl.when(b == 0)
        def _init():
            acc_ref[...] = jnp.zeros_like(acc_ref)

        v = _stat_value(stat, x_ref[...].astype(jnp.float32))     # (H, W)
        if aligned:
            # Tile-boundary-aligned reshape -> pure vreg adds into (8, 128).
            folded = v.reshape(h // _SUBLANES, _SUBLANES, w // _LANES, _LANES)
            acc_ref[...] += folded.sum(axis=2).sum(axis=0)
        else:
            s = jnp.sum(v)                # small slab: XLU reduce is fine
            row = jax.lax.broadcasted_iota(jnp.int32, (_SUBLANES, _LANES), 0)
            lane = jax.lax.broadcasted_iota(jnp.int32, (_SUBLANES, _LANES), 1)
            acc_ref[...] += jnp.where((row == 0) & (lane == 0), s, jnp.float32(0.0))

    return kernel


@functools.partial(jax.jit, static_argnames=("stat",))
def _channel_group_stat(x, chan_ids, stat):
    """(k,) float32 totals of `stat` over x[:, chan_ids[g]] for each g."""
    b, _, h, w = x.shape
    k = chan_ids.shape[0]

    in_spec = pl.BlockSpec(
        (None, None, h, w), lambda g, bi, cids: (bi, cids[g], 0, 0))
    out_spec = pl.BlockSpec(
        (None, _SUBLANES, _LANES), lambda g, bi, cids: (g, 0, 0))

    n_elems = k * b * h * w
    cost = pl.CostEstimate(
        flops=2 * n_elems,
        transcendentals=(2 * n_elems) if stat == "softplus" else 0,
        bytes_accessed=n_elems * x.dtype.itemsize + k * _SUBLANES * _LANES * 4)

    partials = pl.pallas_call(
        _make_channel_kernel(stat, h, w),
        out_shape=jax.ShapeDtypeStruct((k, _SUBLANES, _LANES), jnp.float32),
        grid_spec=pltpu.PrefetchScalarGridSpec(
            num_scalar_prefetch=1,
            grid=(k, b),
            in_specs=[in_spec],
            out_specs=out_spec),
        compiler_params=pltpu.CompilerParams(
            dimension_semantics=("parallel", "arbitrary"),
            vmem_limit_bytes=_VMEM_LIMIT_BYTES),
        cost_estimate=cost,
    )(chan_ids, x)

    return jnp.sum(partials, axis=(1, 2))


# --------------------------------------------------------------------------
# Module wrapper
# --------------------------------------------------------------------------
class DeepDreamPallas:
    """JAX/Pallas re-implementation of the DeepDream loss layer forward pass."""

    def __init__(self, loss_mode, channels="-1", channel_mode="strong",
                 channel_capture="once", scale=0, use_fft=(False, 25)):
        assert scale == 0 and not use_fft[0], (
            "Laplacian pyramid / FFT paths depend on dream_utils (not provided).")
        self.loss_mode = loss_mode.lower()
        self.stat = _MODE_TO_STAT[self.loss_mode]
        self.channels = [int(c) for c in channels.split(",")]
        self.channel_mode = channel_mode
        self.channel_capture = channel_capture

    # DreamLossMode.get_loss / crit_loss (target == zeros) from the kernel stat.
    def _finalize(self, totals, m):
        if self.loss_mode in ("norm", "l2", "abs_l2"):
            return jnp.sum(jnp.sqrt(totals))   # sqrt(sum x^2) per group, summed
        # mean / abs_mean / mse (mean x^2) / bce (mean softplus) are all means.
        return jnp.sum(totals) / jnp.float32(m)

    def __call__(self, x):
        if -1 in self.channels:
            flat = x.reshape(1, -1)
            return self._finalize(
                _flat_group_stat(flat, stat=self.stat), flat.shape[1])

        # get_channel_loss: sum of per-channel-slice losses (channel_capture
        # = 'once' -> fixed channel list, no RankChannels re-ranking here).
        n_ch = x.shape[1]
        in_range = [c for c in self.channels if int(c) < n_ch]
        n_fallback = len(self.channels) - len(in_range)
        loss = jnp.float32(0.0)
        if in_range:
            use_channel_kernel = (
                x.ndim == 4
                and x.shape[2] * x.shape[3] * x.dtype.itemsize
                <= _MAX_CHANNEL_SLAB_BYTES)
            if use_channel_kernel:
                cids = jnp.asarray(in_range, dtype=jnp.int32)
                totals = _channel_group_stat(x, cids, stat=self.stat)
                m = x.shape[0] * x.shape[2] * x.shape[3]
            else:
                # Safety valve for huge per-channel slabs / non-4D inputs:
                # gather + flattened streaming kernel (bounded VMEM blocks).
                sel = jnp.moveaxis(x[:, jnp.asarray(in_range)], 1, 0)
                sel = sel.reshape(len(in_range), -1)
                totals = _flat_group_stat(sel, stat=self.stat)
                m = sel.shape[1]
            loss = loss + self._finalize(totals, m)
        if n_fallback:
            # Out-of-range channel index -> whole-tensor loss (reference fallback).
            flat = x.reshape(1, -1)
            loss = loss + jnp.float32(n_fallback) * self._finalize(
                _flat_group_stat(flat, stat=self.stat), flat.shape[1])
        return loss


# ---------------- pure-JAX reference for verification ----------------
def _ref_loss(x, mode):
    x = x.astype(jnp.float32)
    mode = mode.lower()
    if mode in ("norm", "l2"):
        return jnp.sqrt(jnp.sum(x * x))
    if mode == "mean":
        return jnp.mean(x)
    if mode == "abs_mean":
        return jnp.mean(jnp.abs(x))
    if mode == "abs_l2":
        return jnp.sqrt(jnp.sum(jnp.abs(x) ** 2))
    if mode == "mse":
        return jnp.mean(x * x)
    if mode == "bce":
        return jnp.mean(jnp.logaddexp(0.0, x))
    raise ValueError(mode)


def _ref_deepdream(x, mode, channels):
    chans = [int(c) for c in channels.split(",")]
    if -1 in chans:
        return _ref_loss(x, mode)
    loss = jnp.float32(0.0)
    for c in chans:
        if c < x.shape[1]:
            loss = loss + _ref_loss(x[:, c], mode)
        else:
            loss = loss + _ref_loss(x, mode)
    return loss


if __name__ == "__main__":
    key = jax.random.PRNGKey(0)
    # NCHW, small shapes consistent with a conv feature map.
    x = jax.random.normal(key, (2, 4, 16, 16), dtype=jnp.float32)
    x_bf16 = x.astype(jnp.bfloat16)                                   # native-dtype stream
    x_ragged = jax.random.normal(jax.random.PRNGKey(1), (2, 3, 33, 30),
                                 dtype=jnp.float32)                   # numel % 128 != 0
    x_big = jax.random.normal(jax.random.PRNGKey(2), (1, 16, 129, 256),
                              dtype=jnp.float32)                      # multi-block + split
    x_chan = jax.random.normal(jax.random.PRNGKey(3), (1, 8, 64, 128),
                               dtype=jnp.float32)                     # aligned channel slabs

    cases = [
        (x, "l2", "-1", 1e-5),
        (x, "norm", "-1", 1e-5),
        (x, "mean", "-1", 1e-5),
        (x, "abs_mean", "-1", 1e-5),
        (x, "mse", "-1", 1e-5),
        (x, "bce", "-1", 1e-5),
        (x, "l2", "0,2", 1e-5),        # channel kernel (unaligned slab, scalar fold)
        (x, "abs_mean", "1,7", 1e-5),  # out-of-range channel -> whole-tensor fallback
        (x_bf16, "l2", "-1", 1e-3),    # bf16 streamed natively, cast per-chunk in VMEM
        (x_ragged, "bce", "-1", 1e-5), # lane-ragged: aligned-prefix kernel + JAX tail
        (x_ragged, "mse", "0,2", 1e-5),
        (x_big, "l2", "-1", 1e-4),     # multi-block, gated ragged tile, 2-TC split if avail
        (x_big, "mean", "-1", 1e-4),
        (x_chan, "l2", "0,3,5", 1e-5), # channel kernel, aligned vreg-add fold
    ]

    ok = True
    for xx, mode, channels, tol in cases:
        model = DeepDreamPallas(loss_mode=mode, channels=channels,
                                scale=0, use_fft=(False, 25))
        out = jax.block_until_ready(model(xx))
        ref = jax.block_until_ready(_ref_deepdream(xx, mode, channels))
        if not jnp.allclose(out, ref, rtol=tol, atol=tol):
            ok = False
            print(f"MISMATCH mode={mode} channels={channels} dtype={xx.dtype}: "
                  f"{out} vs {ref}")

    if ok:
        print("KERNEL_OK")
</pallas_src>

<mosaic_0001>
module attributes {stable_mosaic.version = 11 : i64} {
  func.func @kernel(%arg0: i32, %arg1: i32, %arg2: i32, %arg3: memref<1x16x128xf32, #tpu.memory_space<vmem>>, %arg4: memref<1x1x8x128xf32, #tpu.memory_space<vmem>>) attributes {dimension_semantics = [#tpu.dimension_semantics<parallel>, #tpu.dimension_semantics<parallel>, #tpu.dimension_semantics<arbitrary>], iteration_bounds = array<i64: 1, 1, 1>, scalar_prefetch = 0 : i64, scratch_operands = 0 : i64, tpu.core_type = #tpu.core_type<tc>, window_params = [{transform_indices = @transform_0, window_bounds = array<i64: 1, 16, 128>}, {transform_indices = @transform_1, window_bounds = array<i64: 1, 1, 8, 128>}]} {
    %c0_i32 = arith.constant 0 : i32
    %0 = arith.cmpi eq, %arg2, %c0_i32 : i32
    %1 = arith.extui %0 : i1 to i32
    %c0_i32_0 = arith.constant 0 : i32
    %2 = arith.cmpi ne, %1, %c0_i32_0 : i32
    scf.if %2 {
      %cst_12 = arith.constant 0.000000e+00 : f32
      %19 = vector.broadcast %cst_12 : f32 to vector<8x128xf32>
      %c0_13 = arith.constant 0 : index
      %c0_14 = arith.constant 0 : index
      %c0_15 = arith.constant 0 : index
      %c0_16 = arith.constant 0 : index
      %20 = vector.load %arg4[%c0_13, %c0_14, %c0_15, %c0_16] : memref<1x1x8x128xf32, #tpu.memory_space<vmem>>, vector<1x1x8x128xf32>
      %21 = vector.shape_cast %20 : vector<1x1x8x128xf32> to vector<8x128xf32>
      %22 = vector.shape_cast %19 : vector<8x128xf32> to vector<1x1x8x128xf32>
      tpu.vector_store %arg4[%c0_13, %c0_14, %c0_15, %c0_16], %22 {strides = array<i32>} : memref<1x1x8x128xf32, #tpu.memory_space<vmem>>, vector<1x1x8x128xf32>,
    } else {
    }
    %cst = arith.constant 0.000000e+00 : f32
    %3 = vector.broadcast %cst : f32 to vector<8x128xf32>
    %c0 = arith.constant 0 : index
    %c0_1 = arith.constant 0 : index
    %c0_2 = arith.constant 0 : index
    %c0_3 = arith.constant 0 : index
    %4 = vector.load %arg4[%c0, %c0_1, %c0_2, %c0_3] : memref<1x1x8x128xf32, #tpu.memory_space<vmem>>, vector<1x1x8x128xf32>
    %5 = vector.shape_cast %4 : vector<1x1x8x128xf32> to vector<8x128xf32>
    %c0_i32_4 = arith.constant 0 : i32
    %c16_i32 = arith.constant 16 : i32
    %6 = arith.muli %c0_i32_4, %c16_i32 : i32
    %7 = tpu.assume_multiple %6, 8 : i32
    %c0_5 = arith.constant 0 : index
    %8 = arith.index_cast %7 : i32 to index
    %c0_6 = arith.constant 0 : index
    %9 = vector.load %arg3[%c0_5, %8, %c0_6] : memref<1x16x128xf32, #tpu.memory_space<vmem>>, vector<1x16x128xf32>
    %10 = vector.shape_cast %9 : vector<1x16x128xf32> to vector<16x128xf32>
    %11 = arith.mulf %10, %10 : vector<16x128xf32>
    %12 = vector.shape_cast %11 : vector<16x128xf32> to vector<2x8x128xf32>
    %cst_7 = arith.constant dense<0.000000e+00> : vector<8x128xf32>
    %13 = vector.multi_reduction <add>, %12, %cst_7 [0] : vector<2x8x128xf32> to vector<8x128xf32>
    %14 = arith.addf %3, %13 : vector<8x128xf32>
    %c1_i32 = arith.constant 1 : i32
    %15 = arith.addf %5, %14 : vector<8x128xf32>
    %c0_8 = arith.constant 0 : index
    %c0_9 = arith.constant 0 : index
    %c0_10 = arith.constant 0 : index
    %c0_11 = arith.constant 0 : index
    %16 = vector.load %arg4[%c0_8, %c0_9, %c0_10, %c0_11] : memref<1x1x8x128xf32, #tpu.memory_space<vmem>>, vector<1x1x8x128xf32>
    %17 = vector.shape_cast %16 : vector<1x1x8x128xf32> to vector<8x128xf32>
    %18 = vector.shape_cast %15 : vector<8x128xf32> to vector<1x1x8x128xf32>
    tpu.vector_store %arg4[%c0_8, %c0_9, %c0_10, %c0_11], %18 {strides = array<i32>} : memref<1x1x8x128xf32, #tpu.memory_space<vmem>>, vector<1x1x8x128xf32>,
    return
  }
  func.func @transform_0(%arg0: i32, %arg1: i32, %arg2: i32) -> (i32, i32, i32) {
    %c1_i32 = arith.constant 1 : i32
    %0 = arith.muli %arg1, %c1_i32 : i32
    %1 = arith.addi %0, %arg2 : i32
    %c0_i32 = arith.constant 0 : i32
    %2 = arith.minsi %1, %c0_i32 : i32
    %c0_i32_0 = arith.constant 0 : i32
    %c0_i32_1 = arith.constant 0 : i32
    return %arg0, %2, %c0_i32_0 : i32, i32, i32
  }
  func.func @transform_1(%arg0: i32, %arg1: i32, %arg2: i32) -> (i32, i32, i32, i32) {
    %c0_i32 = arith.constant 0 : i32
    %c0_i32_0 = arith.constant 0 : i32
    %c0_i32_1 = arith.constant 0 : i32
    return %arg0, %arg1, %c0_i32, %c0_i32_0 : i32, i32, i32, i32
  }
}

</mosaic_0001>

<bundles_post_ra>
// kernel: _flat_group_stat.1
= control target key start
LH: loop header
LB: loop body
LE: loop exit
PB: predicated region body
PF: predicated region fallthrough
CT: control target
= control target key end

     0   :  { %6 = vsyncpa [#allocation3], 0  ;;  %s81_s6 = smov [#allocation2]   ;;  %s109_s0 = inlined_call_operand.hbm [shape: f32[1,16,128], index: 0, kind: input, shape index: {}]   ;;  %s110_s1 = inlined_call_operand.vmem [shape: f32[1,1,8,128], index: 1, kind: output, shape index: {}]  }
   0x1   :  { %s18_s7 = sshll.u32 %s81_s6, 4  ;;  %s57_s10 = scalar_lea.hbm %s109_s0, 256  ;;  %s19_s7 = int_to_ptr.vmem [resolvable:$true] %s18_s7 }
   0x2   :  { %p58_p0 = scmp.ne.s32.totalorder %s109_s0, %s57_s10  ;;  %p61_p1 = scmp.lt.u32.totalorder %s57_s10, %s109_s0 }
   0x4   :  { %p63_p2 = pnand %p61_p1, %p58_p0 }
   0x6   :  { %66 = shalt.err (!%p63_p2)
}
   0x7   :  { %s67_s15 = scalar_lea.vmem %s19_s7, 256  ;;  %p72_p4 = scmp.lt.s32.totalorder %s19_s7, %s19_s7 }
   0x8   :  { %p68_p3 = scmp.ne.s32.totalorder %s19_s7, %s67_s15  ;;  %p73_p5 = scmp.lt.s32.totalorder %s67_s15, %s67_s15 }
   0xa   :  { %p74_p6 = por %p73_p5, %p72_p4 }
   0xc   :  { %p75_p7 = pnand %p74_p6, %p68_p3 }
   0xe   :  { %78 = shalt.err (!%p75_p7)
}
   0xf   :  { %s82_s16 = smov 128   ;;  %s83_s17 = smov 8  }
  0x10   :  { %24 = dma.hbm_to_vmem [thread:$0]  %s109_s0, 256, %s19_s7, [#allocation3], %s82_s16, %s82_s16, %s83_s17  }
  0x11   :  { %79 = dma.done.wait [#allocation3], 256  }
  0x12   :  { %80 = vsyncadd [#allocation3], 4294967040  ;;  %v38_v0 = vld [vmem:[#allocation2] sm:$0xff]  ;;  %v39_v1 = vld [vmem:[#allocation2 + $0x8] sm:$0xff] }
  0x13   :  { %v40_v2 = vmul.f32 %v38_v0, %v38_v0  ;;  %v41_v3 = vmul.f32 %v39_v1, %v39_v1 }
  0x15   :  { %v42_v4 = vadd.f32 %v41_v3, %v40_v2 }
  0x17   :  { %45 = vst [vmem:[%s110_s1] sm:$0xff] %v42_v4 }
  0x18   :  { %50 = vsyncpa [#allocation3], 1 }

</bundles_post_ra>
